<compile_context>
chip_gen: v7x
topology: tpu7x:2x2x1
jax: 0.10.0
libtpu: 0.0.40
codegen_flags: <defaults>
</compile_context>

<pallas_src>
import functools

import jax
import jax.numpy as jnp
from jax.experimental import pallas as pl
from jax.experimental.pallas import tpu as pltpu


def _round_up(x, m):
    return ((x + m - 1) // m) * m


def _vmem_capacity_bytes():
    """Physical VMEM per TensorCore; conservative (v7x-sized) fallback."""
    try:
        info = pltpu.get_tpu_info()
        cap = int(getattr(info, "vmem_capacity_bytes", 0) or 0)
        if cap > 0:
            return cap
    except Exception:
        pass
    return 64 * 1024 * 1024


def _triplet_kernel(*refs, margin, metric, n_valid, tm, tn, mask_needed):
    if metric == 'euclidean':
        im_ref, sT_ref, d1_ref, d2_ref, xx_ref, yy_ref, out_ref = refs
    else:
        im_ref, sT_ref, d1_ref, d2_ref, out_ref = refs

    i = pl.program_id(0)
    j = pl.program_id(1)

    # The (8, 128) output block is resident across the col-reduction axis j.
    @pl.when(j == 0)
    def _init():
        out_ref[...] = jnp.zeros_like(out_ref)

    f32 = jnp.float32
    # Canonical (tm, K) x (K, tn) MXU contraction; bf16 (or f32) operands,
    # f32 accumulation.
    sim = jnp.dot(im_ref[...], sT_ref[...], preferred_element_type=f32)  # (tm,tn)

    d1 = d1_ref[...].astype(f32)          # (tm, 1)   dist[i, i]
    d2 = d2_ref[...].astype(f32)          # (1, tn)   dist[j, j]

    if metric == 'cosine':
        dist = 1.0 - sim
    else:  # euclidean
        xx = xx_ref[...].astype(f32)      # (tm, 1)   |im_n_i|^2
        yy = yy_ref[...].astype(f32)      # (1, tn)   |s_n_j|^2
        dist = jnp.sqrt(jnp.maximum(xx + yy - 2.0 * sim, 1e-12))

    # MarginRankingLoss(margin, reduction='none') with target y = 1:
    #   cost_im = relu(d1 - dist + margin) ; cost_s = relu(d2 - dist + margin)
    cost = (jnp.maximum(d1 - dist + margin, 0.0)
            + jnp.maximum(d2 - dist + margin, 0.0))                      # (tm,tn)

    if mask_needed:
        # Only emitted when N was padded: cheap (tm,1)/(1,tn) validity vectors.
        row_ids = i * tm + jax.lax.broadcasted_iota(jnp.int32, (tm, 1), 0)
        col_ids = j * tn + jax.lax.broadcasted_iota(jnp.int32, (1, tn), 1)
        valid = jnp.logical_and(row_ids < n_valid, col_ids < n_valid)
        cost = jnp.where(valid, cost, 0.0)

    # Fold (tm, tn) -> (8, 128) with pure vreg-wise adds over tile-aligned
    # static slices (no XLU tree reduction), then store a full unmasked vreg.
    folded = cost[0:8, :]
    for a in range(1, tm // 8):
        folded = folded + cost[a * 8:(a + 1) * 8, :]
    acc = folded[:, 0:128]
    for b in range(1, tn // 128):
        acc = acc + folded[:, b * 128:(b + 1) * 128]
    out_ref[...] = out_ref[...] + acc


def triplet_loss(im, s, *, margin=0.3, metric='cosine', use_bf16=True,
                 block_rows=None, block_cols=None):
    """Pallas TPU implementation of TripletLoss.forward(im, s)."""
    if metric not in ('cosine', 'euclidean'):
        raise ValueError(f"unknown metric: {metric}")
    n, d = im.shape
    assert s.shape == (n, d), "im and s must have the same shape [N, D]"

    d_pad = _round_up(d, 128)
    in_dtype = jnp.bfloat16 if use_bf16 else jnp.float32
    in_bytes = 2 if use_bf16 else 4

    # ---- generation-aware VMEM budget & tile picking ------------------------
    vmem_cap = _vmem_capacity_bytes()
    big_vmem = vmem_cap >= 96 * 1024 * 1024            # v5e / v6e: 128 MiB VMEM
    vmem_limit = (100 * 1024 * 1024) if big_vmem else (46 * 1024 * 1024)
    budget = (80 * 1024 * 1024) if big_vmem else (32 * 1024 * 1024)
    tm_cap = 1024 if big_vmem else 512

    if block_cols is None:
        tn = max(128, min(256, _round_up(n, 128)))
    else:
        tn = max(128, _round_up(block_cols, 128))
    if block_rows is None:
        tm = max(8, min(tm_cap, _round_up(n, 8)))
    else:
        tm = max(8, _round_up(block_rows, 8))

    if block_rows is None and not big_vmem:
        # v7x: 2 TensorCores share the "parallel" row axis -> keep gi >= 2.
        n_rows = _round_up(n, 8)
        if tm >= n_rows and n_rows >= 16:
            tm = max(8, _round_up((n_rows + 1) // 2, 8))

    def _est(tm_, tn_):
        return (2 * tm_ * d_pad * in_bytes       # double-buffered row tile
                + 2 * d_pad * tn_ * in_bytes     # double-buffered col tile
                + 4 * tm_ * tn_ * 4              # sim / dist / cost f32 temps
                + 64 * 1024)                     # tiny vectors / out block

    while _est(tm, tn) > budget and (tm > 8 or tn > 128):
        if tm >= tn and tm > 8:
            tm = max(8, _round_up(tm // 2, 8))
        elif tn > 128:
            tn = max(128, _round_up(tn // 2, 128))
        else:
            break

    n_pad_r = _round_up(n, tm)
    n_pad_c = _round_up(n, tn)
    gi = n_pad_r // tm
    gj = n_pad_c // tn
    mask_needed = (n_pad_r != n) or (n_pad_c != n)

    # ---- one-shot preprocessing (hoisted out of the kernel) ------------------
    f32 = jnp.float32
    imf = im.astype(f32)
    sf = s.astype(f32)
    im_n = imf / jnp.maximum(
        jnp.sqrt(jnp.sum(imf * imf, axis=-1, keepdims=True)), 1e-12)
    s_n = sf / jnp.maximum(
        jnp.sqrt(jnp.sum(sf * sf, axis=-1, keepdims=True)), 1e-12)

    im_nb = im_n.astype(in_dtype)
    s_nb = s_n.astype(in_dtype)
    # f32 views of the (possibly bf16-rounded) streamed operands, so the
    # precomputed diagonal matches the in-kernel MXU values up to
    # accumulation-order noise.
    im_nf = im_nb.astype(f32)
    s_nf = s_nb.astype(f32)

    sim_diag = jnp.sum(im_nf * s_nf, axis=-1)                 # (N,)
    if metric == 'cosine':
        diag = 1.0 - sim_diag
    else:
        xx = jnp.sum(im_nf * im_nf, axis=-1)                  # (N,)
        yy = jnp.sum(s_nf * s_nf, axis=-1)                    # (N,)
        diag = jnp.sqrt(jnp.maximum(xx + yy - 2.0 * sim_diag, 1e-12))

    # Zero padding: does not change dot products; padded rows/cols are masked.
    im_p = jnp.pad(im_nb, ((0, n_pad_r - n), (0, d_pad - d)))
    sT_p = jnp.pad(s_nb.T, ((0, d_pad - d), (0, n_pad_c - n)))
    d1_p = jnp.pad(diag, (0, n_pad_r - n)).reshape(n_pad_r, 1).astype(f32)
    d2_p = jnp.pad(diag, (0, n_pad_c - n)).reshape(1, n_pad_c).astype(f32)

    inputs = [im_p, sT_p, d1_p, d2_p]
    in_specs = [
        pl.BlockSpec((tm, d_pad), lambda i, j: (i, 0)),   # im_n rows (resident over j)
        pl.BlockSpec((d_pad, tn), lambda i, j: (0, j)),   # s_n^T cols (streamed)
        pl.BlockSpec((tm, 1), lambda i, j: (i, 0)),       # dist[i, i]
        pl.BlockSpec((1, tn), lambda i, j: (0, j)),       # dist[j, j]
    ]
    if metric == 'euclidean':
        xx_p = jnp.pad(xx, (0, n_pad_r - n)).reshape(n_pad_r, 1).astype(f32)
        yy_p = jnp.pad(yy, (0, n_pad_c - n)).reshape(1, n_pad_c).astype(f32)
        inputs += [xx_p, yy_p]
        in_specs += [
            pl.BlockSpec((tm, 1), lambda i, j: (i, 0)),   # |im_n_i|^2
            pl.BlockSpec((1, tn), lambda i, j: (0, j)),   # |s_n_j|^2
        ]

    kernel = functools.partial(
        _triplet_kernel, margin=float(margin), metric=metric, n_valid=n,
        tm=tm, tn=tn, mask_needed=mask_needed)

    cost_est = pl.CostEstimate(
        flops=2 * n_pad_r * n_pad_c * d_pad,
        transcendentals=(n_pad_r * n_pad_c if metric == 'euclidean' else 0),
        bytes_accessed=(im_p.size * in_bytes + gi * sT_p.size * in_bytes
                        + gi * 8 * 128 * 4))

    partials = pl.pallas_call(
        kernel,
        out_shape=jax.ShapeDtypeStruct((gi * 8, 128), jnp.float32),
        grid=(gi, gj),
        in_specs=in_specs,
        out_specs=pl.BlockSpec((8, 128), lambda i, j: (i, 0)),
        compiler_params=pltpu.CompilerParams(
            dimension_semantics=("parallel", "arbitrary"),
            vmem_limit_bytes=vmem_limit,
        ),
        cost_estimate=cost_est,
    )(*inputs)

    total = jnp.sum(partials)
    # Diagonal entries of (cost_im + cost_s) are exactly 2*relu(margin) (up to
    # accumulation-order noise between the wrapper diag and the MXU diag); the
    # PyTorch module zeroes them and then averages over all N*N entries.
    diag_correction = 2.0 * n * max(float(margin), 0.0)
    return (total - diag_correction) / float(n * n)


def _triplet_reference(im, s, margin=0.3, metric='cosine'):
    """Pure-JAX (f32) reference mirroring the PyTorch TripletLoss.forward."""
    im_n = im / jnp.maximum(jnp.linalg.norm(im, axis=-1, keepdims=True), 1e-12)
    s_n = s / jnp.maximum(jnp.linalg.norm(s, axis=-1, keepdims=True), 1e-12)
    sim = im_n @ s_n.T
    if metric == 'cosine':
        scores = 1.0 - sim
    else:
        xx = jnp.sum(im_n * im_n, axis=1, keepdims=True)
        yy = jnp.sum(s_n * s_n, axis=1, keepdims=True).T
        scores = jnp.sqrt(jnp.clip(xx + yy - 2.0 * sim, 1e-12, None))
    n = im.shape[0]
    diag = jnp.diag(scores)
    d1 = diag[:, None]
    d2 = diag[None, :]
    cost_im = jnp.maximum(d1 - scores + margin, 0.0)
    cost_s = jnp.maximum(d2 - scores + margin, 0.0)
    mask = 1.0 - jnp.eye(n, dtype=scores.dtype)
    return ((cost_s + cost_im) * mask).mean()


if __name__ == "__main__":
    key = jax.random.PRNGKey(0)
    k1, k2 = jax.random.split(key)
    n, d = 8, 32
    im = jax.random.normal(k1, (n, d), dtype=jnp.float32)
    s = jax.random.normal(k2, (n, d), dtype=jnp.float32)

    for metric in ('cosine', 'euclidean'):
        out = jax.block_until_ready(
            triplet_loss(im, s, margin=0.3, metric=metric))
        ref = jax.block_until_ready(
            _triplet_reference(im, s, margin=0.3, metric=metric))
        assert jnp.isfinite(out), f"non-finite loss ({metric})"
        assert jnp.allclose(out, ref, rtol=5e-3, atol=5e-3), (metric, out, ref)

    print("KERNEL_OK")
</pallas_src>

<mosaic_0001>
module attributes {stable_mosaic.version = 11 : i64} {
  func.func @_triplet_kernel(%arg0: i32, %arg1: i32, %arg2: memref<8x128xbf16, #tpu.memory_space<vmem>>, %arg3: memref<128x128xbf16, #tpu.memory_space<vmem>>, %arg4: memref<8x1xf32, #tpu.memory_space<vmem>>, %arg5: memref<1x128xf32, #tpu.memory_space<vmem>>, %arg6: memref<8x128xf32, #tpu.memory_space<vmem>>) attributes {dimension_semantics = [#tpu.dimension_semantics<parallel>, #tpu.dimension_semantics<arbitrary>], iteration_bounds = array<i64: 1, 1>, scalar_prefetch = 0 : i64, scratch_operands = 0 : i64, tpu.core_type = #tpu.core_type<tc>, window_params = [{transform_indices = @transform_0, window_bounds = array<i64: 8, 128>}, {transform_indices = @transform_1, window_bounds = array<i64: 128, 128>}, {transform_indices = @transform_2, window_bounds = array<i64: 8, 1>}, {transform_indices = @transform_3, window_bounds = array<i64: 1, 128>}, {transform_indices = @transform_4, window_bounds = array<i64: 8, 128>}]} {
    %c0_i32 = arith.constant 0 : i32
    %0 = arith.cmpi eq, %arg1, %c0_i32 : i32
    %1 = arith.extui %0 : i1 to i32
    %c0_i32_0 = arith.constant 0 : i32
    %2 = arith.cmpi ne, %1, %c0_i32_0 : i32
    scf.if %2 {
      %cst_20 = arith.constant 0.000000e+00 : f32
      %43 = vector.broadcast %cst_20 : f32 to vector<8x128xf32>
      %c0_21 = arith.constant 0 : index
      %c0_22 = arith.constant 0 : index
      %44 = vector.load %arg6[%c0_21, %c0_22] : memref<8x128xf32, #tpu.memory_space<vmem>>, vector<8x128xf32>
      tpu.vector_store %arg6[%c0_21, %c0_22], %43 {strides = array<i32>} : memref<8x128xf32, #tpu.memory_space<vmem>>, vector<8x128xf32>,
    } else {
    }
    %c0 = arith.constant 0 : index
    %c0_1 = arith.constant 0 : index
    %3 = vector.load %arg2[%c0, %c0_1] : memref<8x128xbf16, #tpu.memory_space<vmem>>, vector<8x128xbf16>
    %c0_2 = arith.constant 0 : index
    %c0_3 = arith.constant 0 : index
    %4 = vector.load %arg3[%c0_2, %c0_3] : memref<128x128xbf16, #tpu.memory_space<vmem>>, vector<128x128xbf16>
    %cst = arith.constant dense<0.000000e+00> : vector<8x128xf32>
    %5 = tpu.matmul %3, %4, %cst {dimension_numbers = #tpu.dot_dimension_numbers<[1], [0], [0], [1], [0, 0, 1, 1], [], []>} : vector<8x128xbf16>, vector<128x128xbf16>, vector<8x128xf32> -> vector<8x128xf32>
    %c0_4 = arith.constant 0 : index
    %c0_5 = arith.constant 0 : index
    %6 = vector.load %arg4[%c0_4, %c0_5] : memref<8x1xf32, #tpu.memory_space<vmem>>, vector<8x1xf32>
    %c0_6 = arith.constant 0 : index
    %c0_7 = arith.constant 0 : index
    %7 = vector.load %arg5[%c0_6, %c0_7] : memref<1x128xf32, #tpu.memory_space<vmem>>, vector<1x128xf32>
    %cst_8 = arith.constant 1.000000e+00 : f32
    %8 = vector.broadcast %cst_8 : f32 to vector<8x128xf32>
    %9 = arith.subf %8, %5 : vector<8x128xf32>
    %10 = vector.broadcast %6 : vector<8x1xf32> to vector<8x128xf32>
    %11 = arith.subf %10, %9 : vector<8x128xf32>
    %cst_9 = arith.constant 3.000000e-01 : f32
    %12 = vector.broadcast %cst_9 : f32 to vector<8x128xf32>
    %13 = arith.addf %11, %12 : vector<8x128xf32>
    %cst_10 = arith.constant 0.000000e+00 : f32
    %14 = vector.broadcast %cst_10 : f32 to vector<8x128xf32>
    %15 = arith.maximumf %13, %14 : vector<8x128xf32>
    %16 = vector.broadcast %7 : vector<1x128xf32> to vector<8x128xf32>
    %17 = arith.subf %16, %9 : vector<8x128xf32>
    %cst_11 = arith.constant 3.000000e-01 : f32
    %18 = vector.broadcast %cst_11 : f32 to vector<8x128xf32>
    %19 = arith.addf %17, %18 : vector<8x128xf32>
    %cst_12 = arith.constant 0.000000e+00 : f32
    %20 = vector.broadcast %cst_12 : f32 to vector<8x128xf32>
    %21 = arith.maximumf %19, %20 : vector<8x128xf32>
    %22 = arith.addf %15, %21 : vector<8x128xf32>
    %c8_i32 = arith.constant 8 : i32
    %23 = arith.muli %arg0, %c8_i32 : i32
    %24 = tpu.iota {dimensions = array<i32: 0>} : vector<8x1xi32>
    %25 = vector.broadcast %23 : i32 to vector<8x1xi32>
    %26 = arith.addi %25, %24 : vector<8x1xi32>
    %c128_i32 = arith.constant 128 : i32
    %27 = arith.muli %arg1, %c128_i32 : i32
    %28 = tpu.iota {dimensions = array<i32: 1>} : vector<1x128xi32>
    %29 = vector.broadcast %27 : i32 to vector<1x128xi32>
    %30 = arith.addi %29, %28 : vector<1x128xi32>
    %c8_i32_13 = arith.constant 8 : i32
    %31 = vector.broadcast %c8_i32_13 : i32 to vector<8x1xi32>
    %32 = arith.cmpi slt, %26, %31 : vector<8x1xi32>
    %c8_i32_14 = arith.constant 8 : i32
    %33 = vector.broadcast %c8_i32_14 : i32 to vector<1x128xi32>
    %34 = arith.cmpi slt, %30, %33 : vector<1x128xi32>
    %35 = vector.broadcast %32 : vector<8x1xi1> to vector<8x128xi1>
    %36 = vector.broadcast %34 : vector<1x128xi1> to vector<8x128xi1>
    %37 = arith.andi %35, %36 : vector<8x128xi1>
    %cst_15 = arith.constant 0.000000e+00 : f32
    %38 = vector.broadcast %cst_15 : f32 to vector<8x128xf32>
    %39 = arith.select %37, %22, %38 : vector<8x128xi1>, vector<8x128xf32>
    %c0_16 = arith.constant 0 : index
    %c0_17 = arith.constant 0 : index
    %40 = vector.load %arg6[%c0_16, %c0_17] : memref<8x128xf32, #tpu.memory_space<vmem>>, vector<8x128xf32>
    %41 = arith.addf %40, %39 : vector<8x128xf32>
    %c0_18 = arith.constant 0 : index
    %c0_19 = arith.constant 0 : index
    %42 = vector.load %arg6[%c0_18, %c0_19] : memref<8x128xf32, #tpu.memory_space<vmem>>, vector<8x128xf32>
    tpu.vector_store %arg6[%c0_18, %c0_19], %41 {strides = array<i32>} : memref<8x128xf32, #tpu.memory_space<vmem>>, vector<8x128xf32>,
    return
  }
  func.func @transform_0(%arg0: i32, %arg1: i32) -> (i32, i32) {
    %c0_i32 = arith.constant 0 : i32
    %c0_i32_0 = arith.constant 0 : i32
    return %arg0, %c0_i32 : i32, i32
  }
  func.func @transform_1(%arg0: i32, %arg1: i32) -> (i32, i32) {
    %c0_i32 = arith.constant 0 : i32
    %c0_i32_0 = arith.constant 0 : i32
    return %c0_i32, %arg1 : i32, i32
  }
  func.func @transform_2(%arg0: i32, %arg1: i32) -> (i32, i32) {
    %c0_i32 = arith.constant 0 : i32
    %c0_i32_0 = arith.constant 0 : i32
    return %arg0, %c0_i32 : i32, i32
  }
  func.func @transform_3(%arg0: i32, %arg1: i32) -> (i32, i32) {
    %c0_i32 = arith.constant 0 : i32
    %c0_i32_0 = arith.constant 0 : i32
    return %c0_i32, %arg1 : i32, i32
  }
  func.func @transform_4(%arg0: i32, %arg1: i32) -> (i32, i32) {
    %c0_i32 = arith.constant 0 : i32
    %c0_i32_0 = arith.constant 0 : i32
    return %arg0, %c0_i32 : i32, i32
  }
}

</mosaic_0001>

<bundles_post_ra>
// kernel: tpu_custom_call.1
= control target key start
LH: loop header
LB: loop body
LE: loop exit
PB: predicated region body
PF: predicated region fallthrough
CT: control target
= control target key end

     0   :  { %9 = vsyncpa [#allocation3], 0  ;;  %s367_s0 = inlined_call_operand.vmem [shape: bf16[8,128], index: 0, kind: input, shape index: {}]   ;;  %s368_s1 = inlined_call_operand.hbm [shape: bf16[128,128], index: 1, kind: input, shape index: {}]   ;;  %s369_s2 = inlined_call_operand.vmem [shape: f32[8,1], index: 2, kind: input, shape index: {}]   ;;  %s370_s3 = inlined_call_operand.vmem [shape: f32[1,128], index: 3, kind: input, shape index: {}]   ;;  %s371_s4 = inlined_call_operand.hbm [shape: f32[8,128], index: 4, kind: output, shape index: {}]  }
   0x1   :  { %10 = vsyncpa [#allocation4], 0  ;;  %s302_s15 = smov [#allocation2]   ;;  %s254_s19 = scalar_lea.hbm %s368_s1, 1024 }
   0x2   :  { %s18_s16 = sshll.u32 %s302_s15, 4  ;;  %p255_p0 = scmp.ne.s32.totalorder %s368_s1, %s254_s19  ;;  %s19_s16 = int_to_ptr.vmem [resolvable:$true] %s18_s16 }
   0x3   :  { %p258_p1 = scmp.lt.u32.totalorder %s254_s19, %s368_s1 }
   0x5   :  { %p260_p2 = pnand %p258_p1, %p255_p0 }
   0x7   :  { %263 = shalt.err (!%p260_p2)
}
   0x8   :  { %s264_s24 = scalar_lea.vmem %s19_s16, 1024  ;;  %p269_p4 = scmp.lt.s32.totalorder %s19_s16, %s19_s16 }
   0x9   :  { %p265_p3 = scmp.ne.s32.totalorder %s19_s16, %s264_s24  ;;  %p270_p5 = scmp.lt.s32.totalorder %s264_s24, %s264_s24 }
   0xb   :  { %p271_p6 = por %p270_p5, %p269_p4 }
   0xd   :  { %p272_p7 = pnand %p271_p6, %p265_p3 }
   0xf   :  { %275 = shalt.err (!%p272_p7)
}
  0x10   :  { %s303_s25 = smov 64   ;;  %s304_s26 = smov 4  }
  0x11   :  { %24 = dma.hbm_to_vmem [thread:$0]  %s368_s1, 1024, %s19_s16, [#allocation3], %s303_s25, %s303_s25, %s304_s26  }
  0x12   :  { %298 = dma.done.wait [#allocation3], 1024  }
  0x13   :  { %299 = vsyncadd [#allocation3], 4294966272  ;;  %v305_v0 = vmov 0.0   ;;  %vm306_vm0 = vmmov 0   ;;  %v307_v1 = vmov 0   ;;  %v246_v2 = vld [vmem:[#allocation2] sm:$0xff]   ;;  %v170_v14 = vlaneseq }
  0x14   :  { %218 = vmatprep.subr.bf16.mxu0 %v305_v0  ;;  %234 = vmatprep.mubr.msk.bf16.mxu0 %vm306_vm0, %v305_v0  ;;  %v247_v3 = vld [vmem:[#allocation2 + $0x8] sm:$0xff]   ;;  %v248_v4 = vld [vmem:[#allocation2 + $0x10] sm:$0xff]   ;;  %v143_v5 = vld [vmem:[%s369_s2] sm:$0xff] }
  0x15   :  { %245 = vset.pattern.permute.xlu0 %v307_v1  ;;  %219 = vmatpush3.bf16.msra.mxu0 %v246_v2  ;;  %v249_v6 = vld [vmem:[#allocation2 + $0x18] sm:$0xff]   ;;  %v250_v7 = vld [vmem:[#allocation2 + $0x20] sm:$0xff]   ;;  %v251_v8 = vld [vmem:[#allocation2 + $0x28] sm:$0xff]   ;;  %v171_v22 = vand.u32 127, %v170_v14 }
  0x16   :  { %220 = vmatprep.subr.bf16.mxu0 %v305_v0  ;;  %148 = vperm.xlu0 %245, %v143_v5   ;;  %v252_v9 = vld [vmem:[#allocation2 + $0x30] sm:$0xff]   ;;  %v253_v10 = vld [vmem:[#allocation2 + $0x38] sm:$0xff]   ;;  %v38_v11 = vld [vmem:[%s367_s0] sm:$0xf]  ;;  %s308_s0 = smov [#allocation5]  }
  0x17   :  { %v208_v13 = vld [vmem:[%s370_s3] ss:$0 sm:$0xff]  ;;  %vm175_vm1 = vcmp.lt.s32.totalorder %v171_v22, 8  ;;  %s191_s7 = sshll.u32 %s308_s0, 4  ;;  %s192_s7 = int_to_ptr.vmem [resolvable:$true] %s191_s7 }
  0x18   :  { %s276_s3 = scalar_lea.vmem %s192_s7, 128  ;;  %p281_p9 = scmp.lt.s32.totalorder %s192_s7, %s192_s7 }
  0x19   :  { %221 = vmatpush3.bf16.msra.mxu0 %v247_v3  ;;  %p277_p8 = scmp.ne.s32.totalorder %s192_s7, %s276_s3  ;;  %p282_p10 = scmp.lt.s32.totalorder %s276_s3, %s276_s3 }
  0x1a   :  { %222 = vmatprep.subr.bf16.mxu0 %v305_v0 }
  0x1b   :  { %p283_p11 = por %p282_p10, %p281_p9 }
  0x1d   :  { %223 = vmatpush3.bf16.msra.mxu0 %v248_v4  ;;  %p284_p12 = pnand %p283_p11, %p277_p8 }
  0x1e   :  { %224 = vmatprep.subr.bf16.mxu0 %v305_v0 }
  0x21   :  { %225 = vmatpush3.bf16.msra.mxu0 %v249_v6 }
  0x22   :  { %226 = vmatprep.subr.bf16.mxu0 %v305_v0 }
  0x25   :  { %227 = vmatpush3.bf16.msra.mxu0 %v250_v7 }
  0x26   :  { %228 = vmatprep.subr.bf16.mxu0 %v305_v0 }
  0x29   :  { %229 = vmatpush3.bf16.msra.mxu0 %v251_v8 }
  0x2a   :  { %230 = vmatprep.subr.bf16.mxu0 %v305_v0 }
  0x2d   :  { %231 = vmatpush3.bf16.msra.mxu0 %v252_v9 }
  0x2e   :  { %232 = vmatprep.subr.bf16.mxu0 %v305_v0 }
  0x31   :  { %233 = vmatpush3.bf16.msra.mxu0 %v253_v10 }
  0x34   :  { %235 = vmatmul.mubr.bf16.vlgmr.msra.gmra.mrb[0].mxu0 %v38_v11 }
  0x95   :  { %v149_v15 = vpop.permute.xlu0 %148 }
 0x107   :  { %v137_v12 = vpop.f32.mrb[0].mxu0 }
 0x108   :  { %v145_v16 = vsub.f32 1.0, %v137_v12  ;;  %v236_v17 = vpop.f32.mrb[1].mxu0 }
 0x109   :  { %v140_v18 = vpop.f32.mrb[2].mxu0 }
 0x10a   :  { %v160_v19 = vsub.f32 %v208_v13, %v145_v16  ;;  %v151_v20 = vsub.f32 %v149_v15, %v145_v16  ;;  %v237_v21 = vpop.f32.mrb[3].mxu0 }
 0x10c   :  { %v161_v23 = vadd.f32 0.3, %v160_v19  ;;  %v152_v24 = vadd.f32 0.3, %v151_v20 }
 0x10e   :  { %v162_v25 = vmax.f32 %v161_v23, 0.0  ;;  %v153_v26 = vmax.f32 %v152_v24, 0.0 }
 0x110   :  { %v163_v27 = vadd.f32 %v162_v25, %v153_v26 }
 0x112   :  { %v181_v28 = vsel %vm175_vm1, %v163_v27, 0.0 }
 0x113   :  { %184 = vst [vmem:[#allocation5] sm:$0xff] %v181_v28 }
 0x114   :  { %287 = shalt.err (!%p284_p12)
}
 0x115   :  { %s288_s10 = scalar_lea.hbm %s371_s4, 128 }
 0x116   :  { %p289_p13 = scmp.ne.s32.totalorder %s371_s4, %s288_s10  ;;  %p292_p0 = scmp.lt.u32.totalorder %s288_s10, %s371_s4 }
 0x118   :  { %p294_p1 = pnand %p292_p0, %p289_p13 }
 0x11a   :  { %297 = shalt.err (!%p294_p1)
}
 0x11b   :  { %194 = dma.vmem_to_hbm [thread:$0]  %s192_s7, 128, %s371_s4, [#allocation4]  }
 0x11c   :  { %300 = dma.done.wait [#allocation4], 128  }
 0x11d   :  { %301 = vsyncadd [#allocation4], 4294967168 }
 0x11e   :  { %198 = vsyncpa [#allocation3], 1 }
 0x11f   :  { %199 = vsyncpa [#allocation4], 1 }

</bundles_post_ra>
